<compile_context>
chip_gen: v7x
topology: tpu7x:2x2x1
jax: 0.10.0
libtpu: 0.0.40
codegen_flags: <defaults>
</compile_context>

<pallas_src>
import functools

import jax
import jax.numpy as jnp
from jax.experimental import pallas as pl
from jax.experimental.pallas import tpu as pltpu


# ---------------------------------------------------------------------------
# Fast path: whole C resident in VMEM -> single sweep, single kernel.
# ---------------------------------------------------------------------------
def _fused_kernel(gamma_ref, c_ref, o_ref, *, n):
    x = c_ref[...].astype(jnp.float32)                    # (B, L1, L2)
    mean = jnp.sum(x) / n
    var = jnp.sum((x - mean) ** 2) / (n - 1)              # unbiased, centered
    thr = mean + gamma_ref[0] * var                       # mean + gamma*std^2
    rho = jnp.sum(jnp.maximum(x - thr, 0.0), axis=1)      # (B, L2)
    denom = jnp.mean(rho, axis=1, keepdims=True) + 1.0
    o_ref[...] = 1.0 / (1.0 + jnp.exp(rho / denom - 0.5))


# ---------------------------------------------------------------------------
# Phase A: per-(row-tile, lane-tile) centered partials [Sum x, Sum (x-m)^2].
# ---------------------------------------------------------------------------
def _stats_kernel(x_ref, part_ref, *, tile_rows, total_rows, needs_mask):
    i = pl.program_id(0)
    x = x_ref[...].astype(jnp.float32)                    # (tile_rows, tile_l2)
    if needs_mask:                                        # static (trace-time)
        row = i * tile_rows + jax.lax.broadcasted_iota(jnp.int32, x.shape, 0)
        valid = row < total_rows
        x = jnp.where(valid, x, 0.0)
    # rows actually present in this tile (differs only for the last tile)
    count = jnp.minimum(tile_rows, total_rows - i * tile_rows).astype(jnp.float32)
    s = jnp.sum(x, axis=0, keepdims=True)                 # (1, tile_l2)
    d = x - s / count                                     # center on tile-lane mean
    if needs_mask:
        d = jnp.where(valid, d, 0.0)                      # padded rows contribute 0
    m2 = jnp.sum(d * d, axis=0, keepdims=True)            # (1, tile_l2)
    part_ref[:, 0:1, :] = s[None]
    part_ref[:, 1:2, :] = m2[None]


# ---------------------------------------------------------------------------
# Phase B: rho += Sum_L1 relu(C - thr) into a resident (tile_b, tile_l2) block.
# Normalize + sigmoid happens in a tiny fused JAX epilogue on [B, L2].
# ---------------------------------------------------------------------------
def _pool_kernel(thr_ref, c_ref, rho_ref, *, tile_l1, l1, needs_mask):
    k = pl.program_id(2)

    @pl.when(k == 0)
    def _init():
        rho_ref[...] = jnp.zeros_like(rho_ref)

    x = c_ref[...].astype(jnp.float32)                    # (tile_b, tile_l1, tile_l2)
    q = jnp.maximum(x - thr_ref[0], 0.0)                  # fuses into the reduction
    if needs_mask:                                        # static (trace-time)
        row = k * tile_l1 + jax.lax.broadcasted_iota(jnp.int32, x.shape, 1)
        q = jnp.where(row < l1, q, 0.0)
    rho_ref[...] += jnp.sum(q, axis=1)                    # accumulate over L1 tiles
    # Padded batch rows / padded lanes (if any) hold garbage but are dropped by
    # the masked store on writeback; all valid-row math is row/lane-local.


# ---------------------------------------------------------------------------
# Sizing helpers
# ---------------------------------------------------------------------------
@functools.lru_cache(maxsize=1)
def _default_vmem_limit():
    try:
        cap = int(pltpu.get_tpu_info().vmem_capacity_bytes)
    except Exception:
        cap = 64 << 20          # conservative: v7x per-TensorCore VMEM
    return min(int(cap * 3 // 4), 96 << 20)


def _lane_tile(l2, rows_min, itemsize, block_bytes, want_split):
    """Lane-axis tile: full L2, or a multiple of 128 when VMEM (or v7x
    dual-core work distribution) requires a split."""
    if l2 <= 128:
        return l2
    max_lanes = max(128, (block_bytes // (rows_min * itemsize)) // 128 * 128)
    if max_lanes < l2:                       # VMEM forces a lane split
        return max_lanes
    if want_split:                           # give the 2nd TensorCore its own tile
        return max(128, pl.cdiv(pl.cdiv(l2, 2), 128) * 128)
    return l2


# ---------------------------------------------------------------------------
# Wrapper (jitted end-to-end)
# ---------------------------------------------------------------------------
@functools.partial(jax.jit, static_argnames=("block_bytes", "vmem_limit", "force_tiled"))
def _interaction_pooling_impl(C, gamma, *, block_bytes, vmem_limit, force_tiled):
    B, L1, L2 = C.shape
    n = B * L1 * L2
    itemsize = jnp.dtype(C.dtype).itemsize
    gamma32 = jnp.asarray(gamma, jnp.float32).reshape((1,))

    # ---- Fast path: one kernel, one HBM sweep of C ---------------------------
    # Budget: native C + f32 working copy + ~2 temps  ->  4x f32 size.
    if (not force_tiled) and (n * 4) * 4 <= vmem_limit:
        return pl.pallas_call(
            functools.partial(_fused_kernel, n=n),
            out_shape=jax.ShapeDtypeStruct((B, L2), jnp.float32),
            in_specs=[pl.BlockSpec(memory_space=pltpu.MemorySpace.SMEM),   # gamma
                      pl.BlockSpec(memory_space=pltpu.MemorySpace.VMEM)],  # C
            out_specs=pl.BlockSpec(memory_space=pltpu.MemorySpace.VMEM),
            compiler_params=pltpu.CompilerParams(vmem_limit_bytes=vmem_limit),
        )(gamma32, C)

    # ---- Phase A: centered partial stats in one sweep of C -------------------
    total_rows = B * L1
    c2 = C.reshape(total_rows, L2)
    tile_l2a = _lane_tile(L2, 8, itemsize, block_bytes,
                          want_split=(total_rows <= 8))
    n_ja = pl.cdiv(L2, tile_l2a)
    max_rows = max(8, (block_bytes // (tile_l2a * itemsize)) // 8 * 8)
    tile_rows = min(total_rows, max_rows)
    if n_ja == 1 and tile_rows >= total_rows and total_rows > 8:
        # split rows ~in half so both v7x TensorCores stream C
        tile_rows = max(8, pl.cdiv(pl.cdiv(total_rows, 2), 8) * 8)
    n_ia = pl.cdiv(total_rows, tile_rows)
    needs_mask_a = (total_rows % tile_rows) != 0

    partials = pl.pallas_call(
        functools.partial(_stats_kernel, tile_rows=tile_rows,
                          total_rows=total_rows, needs_mask=needs_mask_a),
        out_shape=jax.ShapeDtypeStruct((n_ia, 2, L2), jnp.float32),
        grid=(n_ia, n_ja),
        in_specs=[pl.BlockSpec((tile_rows, tile_l2a), lambda i, j: (i, j))],
        out_specs=pl.BlockSpec((1, 2, tile_l2a), lambda i, j: (i, 0, j)),
        compiler_params=pltpu.CompilerParams(
            dimension_semantics=("parallel", "parallel"),
            vmem_limit_bytes=vmem_limit),
    )(c2)

    # Tiny epilogue: Chan/parallel combine of centered partials (no cancellation).
    counts = jnp.minimum(tile_rows,
                         total_rows - jnp.arange(n_ia) * tile_rows
                         ).astype(jnp.float32)                    # rows per tile
    s = partials[:, 0, :]                                         # (n_ia, L2)
    m2 = partials[:, 1, :]
    mean = jnp.sum(s) / n
    lane_mean = s / counts[:, None]
    var = (jnp.sum(m2)
           + jnp.sum(counts[:, None] * (lane_mean - mean) ** 2)) / (n - 1)
    thr = (mean + gamma32[0] * var).reshape((1,))                 # mean + gamma*std^2

    # ---- Phase B: thresholded relu + L1 reduction -----------------------------
    tile_b = min(B, 8)
    n_b = pl.cdiv(B, tile_b)
    tile_l2b = _lane_tile(L2, tile_b * 8, itemsize, block_bytes,
                          want_split=(n_b == 1))
    n_jb = pl.cdiv(L2, tile_l2b)
    max_l1 = max(8, (block_bytes // (tile_b * tile_l2b * itemsize)) // 8 * 8)
    tile_l1 = min(L1, max_l1)
    n_k = pl.cdiv(L1, tile_l1)
    needs_mask_b = (L1 % tile_l1) != 0

    rho = pl.pallas_call(
        functools.partial(_pool_kernel, tile_l1=tile_l1, l1=L1,
                          needs_mask=needs_mask_b),
        out_shape=jax.ShapeDtypeStruct((B, L2), jnp.float32),
        grid=(n_b, n_jb, n_k),
        in_specs=[
            pl.BlockSpec(memory_space=pltpu.MemorySpace.SMEM),             # thr
            pl.BlockSpec((tile_b, tile_l1, tile_l2b),
                         lambda b, j, k: (b, k, j)),                       # C tiles
        ],
        out_specs=pl.BlockSpec((tile_b, tile_l2b), lambda b, j, k: (b, j)),  # acc
        compiler_params=pltpu.CompilerParams(
            dimension_semantics=("parallel", "parallel", "arbitrary"),
            vmem_limit_bytes=vmem_limit),
    )(thr, C)

    # Row-local normalize + sigmoid on the tiny [B, L2] result (fused by XLA,
    # negligible next to the C sweeps).
    denom = jnp.mean(rho, axis=1, keepdims=True) + 1.0
    return 1.0 / (1.0 + jnp.exp(rho / denom - 0.5))


def interaction_pooling(C, gamma, *, block_bytes=None, vmem_limit=None,
                        force_tiled=False):
    """Pallas TPU implementation of InteractionPooling.forward.

    C:     [B, L1, L2] array (streamed in its native dtype, f32 math in-kernel)
    gamma: [1] learnable scalar
    """
    if vmem_limit is None:
        vmem_limit = _default_vmem_limit()
    if block_bytes is None:
        block_bytes = min(vmem_limit // 4, 16 << 20)
    return _interaction_pooling_impl(C, gamma, block_bytes=int(block_bytes),
                                     vmem_limit=int(vmem_limit),
                                     force_tiled=bool(force_tiled))


def interaction_pooling_ref(C, gamma):
    """Pure-JAX reference mirroring the PyTorch forward."""
    C = C.astype(jnp.float32)
    n = C.size
    mean = jnp.mean(C)
    var = jnp.sum((C - mean) ** 2) / (n - 1)   # unbiased, like torch.std default
    Q = jax.nn.relu(C - mean - gamma[0] * var)
    rho = jnp.sum(Q, axis=1)
    rho = rho / (jnp.mean(rho, axis=1) + 1.0)[:, None]
    return 1.0 / (1.0 + jnp.exp(rho - 0.5))


if __name__ == "__main__":
    gamma = jnp.ones((1,), dtype=jnp.float32)     # nn.Parameter(torch.ones(1))

    # 1) Small f32 interaction map -> single-sweep fused fast path.
    B, L1, L2 = 2, 16, 128
    C = jax.random.normal(jax.random.PRNGKey(0), (B, L1, L2), dtype=jnp.float32)
    out = jax.block_until_ready(interaction_pooling(C, gamma))
    ref = interaction_pooling_ref(C, gamma)
    assert out.shape == (B, L2)
    assert jnp.allclose(out, ref, atol=1e-5, rtol=1e-5), "mismatch (fast path)"

    # 2) Forced tiled path with tiny blocks: multi-tile stats (Chan combine)
    #    + L1 accumulator path.
    out_t = jax.block_until_ready(
        interaction_pooling(C, gamma, block_bytes=8 * 1024, force_tiled=True))
    assert jnp.allclose(out_t, ref, atol=1e-5, rtol=1e-5), "mismatch (tiled path)"

    # 3) bf16 input (native-dtype DMA) + masked tiles (L1 and row counts not
    #    multiples of the tile sizes), both fast and tiled paths.
    B2, L12, L22 = 3, 20, 128
    C2 = jax.random.normal(jax.random.PRNGKey(1), (B2, L12, L22),
                           dtype=jnp.bfloat16)
    ref2 = interaction_pooling_ref(C2, gamma)
    out2f = jax.block_until_ready(interaction_pooling(C2, gamma))
    assert jnp.allclose(out2f, ref2, atol=2e-4, rtol=2e-4), "mismatch (bf16 fast)"
    out2t = jax.block_until_ready(
        interaction_pooling(C2, gamma, block_bytes=8 * 1024, force_tiled=True))
    assert jnp.allclose(out2t, ref2, atol=2e-4, rtol=2e-4), "mismatch (bf16 tiled)"

    print("KERNEL_OK")
</pallas_src>

<mosaic_0001>
module attributes {stable_mosaic.version = 11 : i64} {
  func.func @_fused_kernel(%arg0: memref<1xf32, #tpu.memory_space<smem>>, %arg1: memref<2x16x128xf32, #tpu.memory_space<vmem>>, %arg2: memref<2x128xf32, #tpu.memory_space<vmem>>) attributes {dimension_semantics = [], scalar_prefetch = 0 : i64, scratch_operands = 0 : i64, tpu.core_type = #tpu.core_type<tc>} {
    %c0 = arith.constant 0 : index
    %c0_0 = arith.constant 0 : index
    %c0_1 = arith.constant 0 : index
    %0 = vector.load %arg1[%c0, %c0_0, %c0_1] : memref<2x16x128xf32, #tpu.memory_space<vmem>>, vector<2x16x128xf32>
    %1 = vector.shape_cast %0 : vector<2x16x128xf32> to vector<1x2x16x128xf32>
    %cst = arith.constant dense<0.000000e+00> : vector<1xf32>
    %2 = vector.multi_reduction <add>, %1, %cst [1, 2, 3] : vector<1x2x16x128xf32> to vector<1xf32>
    %3 = vector.shape_cast %2 : vector<1xf32> to vector<1x1x1x1xf32>
    %4 = vector.extract %3[0, 0, 0, 0] : f32 from vector<1x1x1x1xf32>
    %cst_2 = arith.constant 4.096000e+03 : f32
    %5 = arith.divf %4, %cst_2 : f32
    %6 = vector.broadcast %5 : f32 to vector<2x16x128xf32>
    %7 = arith.subf %0, %6 : vector<2x16x128xf32>
    %8 = arith.mulf %7, %7 : vector<2x16x128xf32>
    %9 = vector.shape_cast %8 : vector<2x16x128xf32> to vector<1x2x16x128xf32>
    %cst_3 = arith.constant dense<0.000000e+00> : vector<1xf32>
    %10 = vector.multi_reduction <add>, %9, %cst_3 [1, 2, 3] : vector<1x2x16x128xf32> to vector<1xf32>
    %11 = vector.shape_cast %10 : vector<1xf32> to vector<1x1x1x1xf32>
    %12 = vector.extract %11[0, 0, 0, 0] : f32 from vector<1x1x1x1xf32>
    %cst_4 = arith.constant 4.095000e+03 : f32
    %13 = arith.divf %12, %cst_4 : f32
    %c0_5 = arith.constant 0 : index
    %14 = memref.load %arg0[%c0_5] : memref<1xf32, #tpu.memory_space<smem>>
    %15 = arith.mulf %14, %13 : f32
    %16 = arith.addf %5, %15 : f32
    %17 = vector.broadcast %16 : f32 to vector<2x16x128xf32>
    %18 = arith.subf %0, %17 : vector<2x16x128xf32>
    %cst_6 = arith.constant 0.000000e+00 : f32
    %19 = vector.broadcast %cst_6 : f32 to vector<2x16x128xf32>
    %20 = arith.maximumf %18, %19 : vector<2x16x128xf32>
    %cst_7 = arith.constant dense<0.000000e+00> : vector<2x128xf32>
    %21 = vector.multi_reduction <add>, %20, %cst_7 [1] : vector<2x16x128xf32> to vector<2x128xf32>
    %cst_8 = arith.constant dense<0.000000e+00> : vector<2xf32>
    %22 = vector.multi_reduction <add>, %21, %cst_8 [1] : vector<2x128xf32> to vector<2xf32>
    %23 = vector.shape_cast %22 : vector<2xf32> to vector<2x1xf32>
    %cst_9 = arith.constant 1.280000e+02 : f32
    %24 = vector.broadcast %cst_9 : f32 to vector<2x1xf32>
    %25 = arith.divf %23, %24 : vector<2x1xf32>
    %cst_10 = arith.constant 1.000000e+00 : f32
    %26 = vector.broadcast %cst_10 : f32 to vector<2x1xf32>
    %27 = arith.addf %25, %26 : vector<2x1xf32>
    %28 = vector.broadcast %27 : vector<2x1xf32> to vector<2x128xf32>
    %29 = arith.divf %21, %28 : vector<2x128xf32>
    %cst_11 = arith.constant 5.000000e-01 : f32
    %30 = vector.broadcast %cst_11 : f32 to vector<2x128xf32>
    %31 = arith.subf %29, %30 : vector<2x128xf32>
    %32 = math.exp %31 : vector<2x128xf32>
    %cst_12 = arith.constant 1.000000e+00 : f32
    %33 = vector.broadcast %cst_12 : f32 to vector<2x128xf32>
    %34 = arith.addf %33, %32 : vector<2x128xf32>
    %cst_13 = arith.constant 1.000000e+00 : f32
    %35 = vector.broadcast %cst_13 : f32 to vector<2x128xf32>
    %36 = arith.divf %35, %34 : vector<2x128xf32>
    %c0_14 = arith.constant 0 : index
    %c0_15 = arith.constant 0 : index
    %37 = vector.load %arg2[%c0_14, %c0_15] : memref<2x128xf32, #tpu.memory_space<vmem>>, vector<2x128xf32>
    tpu.vector_store %arg2[%c0_14, %c0_15], %36 {strides = array<i32>} : memref<2x128xf32, #tpu.memory_space<vmem>>, vector<2x128xf32>,
    return
  }
}

</mosaic_0001>

<bundles_post_ra>
// kernel: _interaction_pooling_impl.1
= control target key start
LH: loop header
LB: loop body
LE: loop exit
PB: predicated region body
PF: predicated region fallthrough
CT: control target
= control target key end

     0   :  { %8 = vsyncpa [#allocation4], 0  ;;  %s267_s0 = inlined_call_operand.<no memory space> [shape: f32[1], index: 0, kind: input, shape index: {}]   ;;  %s268_s1 = inlined_call_operand.hbm [shape: f32[2,16,128], index: 1, kind: input, shape index: {}]   ;;  %s269_s2 = inlined_call_operand.hbm [shape: f32[2,128], index: 2, kind: output, shape index: {}]  }
   0x1   :  { %9 = vsyncpa [#allocation5], 0  ;;  %s219_s9 = smov [#allocation3]   ;;  %s171_s13 = scalar_lea.hbm %s268_s1, 512 }
   0x2   :  { %s17_s10 = sshll.u32 %s219_s9, 4  ;;  %p172_p0 = scmp.ne.s32.totalorder %s268_s1, %s171_s13  ;;  %s18_s10 = int_to_ptr.vmem [resolvable:$true] %s17_s10 }
   0x3   :  { %p175_p1 = scmp.lt.u32.totalorder %s171_s13, %s268_s1 }
   0x5   :  { %p177_p2 = pnand %p175_p1, %p172_p0 }
   0x7   :  { %180 = shalt.err (!%p177_p2)
}
   0x8   :  { %s181_s18 = scalar_lea.vmem %s18_s10, 512  ;;  %p186_p4 = scmp.lt.s32.totalorder %s18_s10, %s18_s10 }
   0x9   :  { %p182_p3 = scmp.ne.s32.totalorder %s18_s10, %s181_s18  ;;  %p187_p5 = scmp.lt.s32.totalorder %s181_s18, %s181_s18 }
   0xb   :  { %p188_p6 = por %p187_p5, %p186_p4 }
   0xd   :  { %p189_p7 = pnand %p188_p6, %p182_p3 }
   0xf   :  { %192 = shalt.err (!%p189_p7)
}
  0x10   :  { %s220_s19 = smov 128   ;;  %s221_s20 = smov 8  }
  0x11   :  { %23 = dma.hbm_to_vmem [thread:$0]  %s268_s1, 512, %s18_s10, [#allocation4], %s220_s19, %s220_s19, %s221_s20  }
  0x12   :  { %215 = dma.done.wait [#allocation4], 512  }
  0x13   :  { %216 = vsyncadd [#allocation4], 4294966784  ;;  %v27_v0 = vld [vmem:[#allocation3] sm:$0xff]  ;;  %v28_v1 = vld [vmem:[#allocation3 + $0x8] sm:$0xff]  ;;  %vm98_vm0 = vcmask 1041409   ;;  %vm101_vm1 = vcmask 1041408  }
  0x14   :  { %v29_v2 = vld [vmem:[#allocation3 + $0x10] sm:$0xff]  ;;  %v31_v3 = vadd.f32 %v28_v1, %v27_v0  ;;  %v30_v4 = vld [vmem:[#allocation3 + $0x18] sm:$0xff] }
  0x16   :  { %v32_v5 = vadd.f32 %v31_v3, %v29_v2 }
  0x18   :  { %v33_v6 = vadd.f32 %v32_v5, %v30_v4 }
  0x1a   :  { %34 = vadd.xlane.f32.xlu0 %v33_v6 }
  0xa7   :  { %v35_v7 = vpop.xlane.xlu0 %34 }
  0xa8   :  { %v36_v8 = vrot.slane %v35_v7, 4 }
  0xaa   :  { %v37_v9 = vadd.f32 %v36_v8, %v35_v7 }
  0xac   :  { %v38_v10 = vrot.slane %v37_v9, 2 }
  0xae   :  { %v39_v11 = vadd.f32 %v38_v10, %v37_v9 }
  0xb0   :  { %v40_v12 = vrot.slane %v39_v11, 1 }
  0xb2   :  { %v41_v13 = vadd.f32 %v40_v12, %v39_v11 }
  0xb4   :  { %151 = vpush %v41_v13 }
  0xe5   :  { %s152_s23 = spop %151 }
  0xe6   :  { %s45_s1 = smul.f32 0.00024414063, %s152_s23 }
  0xe8   :  { %v46_v14 = vstv %s45_s1 }
  0xe9   :  { %v47_v15 = vsub.f32 %v27_v0, %v46_v14  ;;  %v48_v16 = vsub.f32 %v28_v1, %v46_v14  ;;  %v49_v17 = vsub.f32 %v29_v2, %v46_v14  ;;  %v50_v20 = vsub.f32 %v30_v4, %v46_v14 }
  0xeb   :  { %v51_v18 = vmul.f32 %v47_v15, %v47_v15  ;;  %v52_v19 = vmul.f32 %v48_v16, %v48_v16  ;;  %v53_v21 = vmul.f32 %v49_v17, %v49_v17  ;;  %v54_v23 = vmul.f32 %v50_v20, %v50_v20 }
  0xed   :  { %v55_v22 = vadd.f32 %v52_v19, %v51_v18 }
  0xef   :  { %v56_v24 = vadd.f32 %v55_v22, %v53_v21 }
  0xf1   :  { %v57_v25 = vadd.f32 %v56_v24, %v54_v23 }
  0xf3   :  { %58 = vadd.xlane.f32.xlu0 %v57_v25 }
 0x180   :  { %v59_v26 = vpop.xlane.xlu0 %58 }
 0x181   :  { %v60_v27 = vrot.slane %v59_v26, 4 }
 0x183   :  { %v61_v28 = vadd.f32 %v60_v27, %v59_v26 }
 0x185   :  { %v62_v29 = vrot.slane %v61_v28, 2 }
 0x187   :  { %v63_v30 = vadd.f32 %v62_v29, %v61_v28 }
 0x189   :  { %v64_v31 = vrot.slane %v63_v30, 1 }
 0x18b   :  { %v65_v32 = vadd.f32 %v64_v31, %v63_v30 }
 0x18d   :  { %153 = vpush %v65_v32 }
 0x1be   :  { %s154_s24 = spop %153 }
 0x1bf   :  { %s69_s25 = smul.f32 0.00024420026, %s154_s24 }
 0x1c1   :  { %s71_s28 = smul.f32 %s69_s25, %s267_s0  ;;  %s222_s0 = smov [#allocation6]  }
 0x1c2   :  { %s140_s30 = sshll.u32 %s222_s0, 4  ;;  %s141_s30 = int_to_ptr.vmem [resolvable:$true] %s140_s30 }
 0x1c3   :  { %s72_s29 = sadd.f32 %s71_s28, %s45_s1  ;;  %s193_s3 = scalar_lea.vmem %s141_s30, 32 }
 0x1c4   :  { %p194_p8 = scmp.ne.s32.totalorder %s141_s30, %s193_s3  ;;  %p198_p9 = scmp.lt.s32.totalorder %s141_s30, %s141_s30 }
 0x1c5   :  { %v73_v33 = vstv %s72_s29  ;;  %p199_p10 = scmp.lt.s32.totalorder %s193_s3, %s193_s3 }
 0x1c6   :  { %v74_v34 = vsub.f32 %v27_v0, %v73_v33  ;;  %v75_v35 = vsub.f32 %v28_v1, %v73_v33  ;;  %v76_v36 = vsub.f32 %v29_v2, %v73_v33  ;;  %v77_v37 = vsub.f32 %v30_v4, %v73_v33 }
 0x1c7   :  { %p200_p11 = por %p199_p10, %p198_p9 }
 0x1c8   :  { %v78_v38 = vmax.f32 %v74_v34, 0.0  ;;  %v79_v39 = vmax.f32 %v75_v35, 0.0  ;;  %v80_v40 = vmax.f32 %v76_v36, 0.0  ;;  %v81_v41 = vmax.f32 %v77_v37, 0.0 }
 0x1c9   :  { %p201_p12 = pnand %p200_p11, %p194_p8 }
 0x1ca   :  { %v82_v42 = vadd.f32 %v79_v39, %v78_v38  ;;  %v89_v43 = vadd.f32 %v81_v41, %v80_v40 }
 0x1cc   :  { %v83_v44 = vrot.slane %v82_v42, 4  ;;  %v90_v45 = vrot.slane %v89_v43, 4 }
 0x1ce   :  { %v84_v46 = vadd.f32 %v83_v44, %v82_v42  ;;  %v91_v47 = vadd.f32 %v90_v45, %v89_v43 }
 0x1d0   :  { %v85_v48 = vrot.slane %v84_v46, 2  ;;  %v92_v49 = vrot.slane %v91_v47, 2 }
 0x1d2   :  { %v86_v50 = vadd.f32 %v85_v48, %v84_v46  ;;  %v93_v51 = vadd.f32 %v92_v49, %v91_v47 }
 0x1d4   :  { %v87_v52 = vrot.slane %v86_v50, 1  ;;  %v94_v53 = vrot.slane %v93_v51, 1 }
 0x1d6   :  { %v88_v54 = vadd.f32 %v87_v52, %v86_v50  ;;  %v95_v55 = vadd.f32 %v94_v53, %v93_v51 }
 0x1d8   :  { %v99_v56 = vsel %vm98_vm0, %v95_v55, %v88_v54 }
 0x1d9   :  { %v102_v57 = vsel %vm101_vm1, %v99_v56, 0.0 }
 0x1da   :  { %103 = vadd.xlane.f32.xlu1 %v102_v57 }
 0x267   :  { %v104_v58 = vpop.xlane.xlu1 %103 }
 0x268   :  { %v106_v59 = vmul.f32 0.0078125, %v104_v58 }
 0x26a   :  { %v107_v60 = vadd.f32 1.0, %v106_v59 }
 0x26c   :  { %v109_v61 = vrot.slane %v107_v60, 1  ;;  %159 = vrcp.f32 %v107_v60 }
 0x26e   :  { %161 = vrcp.f32 %v109_v61 }
 0x276   :  { %v160_v62 = vpop.eup %159 }
 0x277   :  { %v113_v63 = vmul.f32 %v160_v62, %v88_v54 }
 0x278   :  { %v162_v0 = vpop.eup %161 }
 0x279   :  { %v115_v1 = vmul.f32 %v162_v0, %v95_v55  ;;  %v149_v2 = vadd.f32 -0.5, %v113_v63 }
 0x27b   :  { %v118_v3 = vmul.f32 1.442695, %v149_v2  ;;  %v150_v4 = vadd.f32 -0.5, %v115_v1 }
 0x27d   :  { %163 = vpow2.f32 %v118_v3  ;;  %v120_v5 = vmul.f32 1.442695, %v150_v4 }
 0x27f   :  { %165 = vpow2.f32 %v120_v5 }
 0x287   :  { %v164_v6 = vpop.eup %163 }
 0x288   :  { %v122_v8 = vadd.f32 1.0, %v164_v6 }
 0x289   :  { %v166_v7 = vpop.eup %165 }
 0x28a   :  { %v123_v9 = vadd.f32 1.0, %v166_v7 }
 0x28c   :  { %167 = vrcp.f32 %v123_v9 }
 0x28d   :  { %169 = vrcp.f32 %v122_v8 }
 0x296   :  { %v168_v10 = vpop.eup %167 }
 0x297   :  { %v130_v11 = vrot.slane %v168_v10, 7  ;;  %v170_v12 = vpop.eup %169 }
 0x299   :  { %v131_v13 = vsel %vm98_vm0, %v130_v11, %v170_v12 }
 0x29a   :  { %133 = vst [vmem:[#allocation6] sm:$0x3] %v131_v13 }
 0x29b   :  { %204 = shalt.err (!%p201_p12)
}
 0x29c   :  { %s205_s6 = scalar_lea.hbm %s269_s2, 32 }
 0x29d   :  { %p206_p13 = scmp.ne.s32.totalorder %s269_s2, %s205_s6  ;;  %p209_p0 = scmp.lt.u32.totalorder %s205_s6, %s269_s2 }
 0x29f   :  { %p211_p1 = pnand %p209_p0, %p206_p13 }
 0x2a1   :  { %214 = shalt.err (!%p211_p1)
}
 0x2a2   :  { %143 = dma.vmem_to_hbm [thread:$0]  %s141_s30, 32, %s269_s2, [#allocation5]  }
 0x2a3   :  { %217 = dma.done.wait [#allocation5], 32  }
 0x2a4   :  { %218 = vsyncadd [#allocation5], 4294967264 }
 0x2a5   :  { %147 = vsyncpa [#allocation4], 1 }
 0x2a6   :  { %148 = vsyncpa [#allocation5], 1 }

</bundles_post_ra>
